<compile_context>
chip_gen: v7x
topology: tpu7x:2x2x1
jax: 0.10.0
libtpu: 0.0.40
codegen_flags: <defaults>
</compile_context>

<pallas_src>
import functools
import math

import jax
import jax.numpy as jnp
from jax.experimental import pallas as pl
from jax.experimental.pallas import tpu as pltpu


def _self_attention_kernel(x_ref, wq_ref, bq_ref, wk_ref, bk_ref, wv_ref, bv_ref,
                           gamma_ref, beta_ref, out_ref, attn_ref,
                           k_scratch, v_scratch, *, q_tile, scale_inv, eps):
    """One grid step == (batch element b, query tile qi).

    Ref shapes:
      x_ref      : (1, S, H)   full sequence of batch b (LN source + residual)
      wq_ref     : (H, A) bf16   bq_ref: (1, A) f32
      wk_ref     : (H, A) bf16   bk_ref: (1, A) f32
      wv_ref     : (H, H) bf16   bv_ref: (1, H) f32
      gamma/beta : (1, H) f32    LayerNorm affine params
      out_ref    : (1, Tq, H)
      attn_ref   : (1, Tq, S)
      k_scratch  : (S, A) bf16   persistent across the q axis (per batch)
      v_scratch  : (S, H) bf16
    """
    # ---- once per batch element: LayerNorm full sequence, project K and V ----
    @pl.when(pl.program_id(1) == 0)
    def _():
        x = x_ref[0]                                        # (S, H) f32
        mean = jnp.mean(x, axis=-1, keepdims=True)
        centered = x - mean
        var = jnp.mean(centered * centered, axis=-1, keepdims=True)
        normed = centered * jax.lax.rsqrt(var + eps)
        normed = normed * gamma_ref[0] + beta_ref[0]        # (S, H) f32
        nb = normed.astype(jnp.bfloat16)
        k_scratch[...] = (jnp.dot(nb, wk_ref[...],
                                  preferred_element_type=jnp.float32)
                          + bk_ref[0]).astype(jnp.bfloat16)
        v_scratch[...] = (jnp.dot(nb, wv_ref[...],
                                  preferred_element_type=jnp.float32)
                          + bv_ref[0]).astype(jnp.bfloat16)

    # ---- per query tile: LayerNorm + Q projection of the tile only ----------
    q_start = pl.program_id(1) * q_tile
    if q_tile % 8 == 0:
        q_start = pl.multiple_of(q_start, 8)
    xt = x_ref[0, pl.ds(q_start, q_tile), :]                # (Tq, H) f32 (residual)

    mean_t = jnp.mean(xt, axis=-1, keepdims=True)
    ct = xt - mean_t
    var_t = jnp.mean(ct * ct, axis=-1, keepdims=True)
    normed_t = ct * jax.lax.rsqrt(var_t + eps) * gamma_ref[0] + beta_ref[0]

    q = (jnp.dot(normed_t.astype(jnp.bfloat16), wq_ref[...],
                 preferred_element_type=jnp.float32) + bq_ref[0]) * scale_inv
    qb = q.astype(jnp.bfloat16)                             # (Tq, A), scale folded in

    # ---- energy = (Q/sqrt(A)) @ K^T : contract feature dim, no k transpose ---
    energy = jax.lax.dot_general(
        qb, k_scratch[...], dimension_numbers=(((1,), (1,)), ((), ())),
        preferred_element_type=jnp.float32)                 # (Tq, S)

    # TODO(synk): optional `mask` argument of the PyTorch forward is not
    # implemented (module is exercised with mask=None).

    # ---- numerically stable softmax (exact divide so rows sum to 1) ---------
    m = jnp.max(energy, axis=-1, keepdims=True)
    e = jnp.exp(energy - m)
    attn = e / jnp.sum(e, axis=-1, keepdims=True)           # (Tq, S) f32

    # ---- attention @ V (bf16 MXU) + residual with the original x tile -------
    out = jnp.dot(attn.astype(jnp.bfloat16), v_scratch[...],
                  preferred_element_type=jnp.float32) + xt  # (Tq, H)

    out_ref[0] = out.astype(out_ref.dtype)
    attn_ref[0] = attn.astype(attn_ref.dtype)


def _vmem_capacity_bytes():
    try:
        return int(pltpu.get_tpu_info().vmem_capacity_bytes)
    except Exception:
        return 64 * 2**20        # conservative (v7x per-TC capacity)


def _vmem_estimate_bytes(S, H, A, Tq):
    """Per-grid-step VMEM footprint (weights single-buffered, I/O double)."""
    f32, bf16 = 4, 2
    weights = (2 * H * A + H * H) * bf16 + (2 * A + H) * f32 + 2 * H * f32
    kv_scratch = S * (A + H) * bf16
    x_io = 2 * S * H * f32                                  # (1,S,H) in, 2 buffers
    out_io = 2 * Tq * H * f32 + 2 * Tq * S * f32            # out + attn, 2 buffers
    live_proj = 2 * S * H * f32 + S * H * bf16 + S * max(A, H) * f32   # q==0 step
    live_tile = 3 * Tq * H * f32 + Tq * A * f32 + 3 * Tq * S * f32 \
        + Tq * (A + S) * bf16
    return weights + kv_scratch + x_io + out_io + max(live_proj, live_tile)


def _choose_q_tile(S, H, A, budget_bytes):
    """Largest query tile (divisor of S, multiple of 8, or S itself) in budget.

    Candidates are descending so 256-multiples (v6e/v7x MXU) win when they fit.
    """
    candidates = [S] + [t for t in (2048, 1024, 512, 256, 128, 64, 32, 16, 8)
                        if t < S and S % t == 0]
    for t in candidates:
        if _vmem_estimate_bytes(S, H, A, t) <= budget_bytes:
            return t
    # TODO(synk): if even the smallest tile overflows, a sequence(K)-tiled
    # attention path is needed; degrade gracefully to the smallest tile here.
    return candidates[-1]


def self_attention(hidden_states, params, *, q_tile=None):
    """hidden_states: (B, S, H) f32. Returns (output (B,S,H), attention (B,S,S))."""
    B, S, H = hidden_states.shape
    A = params["wq"].shape[1]

    vmem_budget = int(0.65 * _vmem_capacity_bytes())
    if q_tile is None:
        q_tile = _choose_q_tile(S, H, A, vmem_budget)
    assert S % q_tile == 0
    num_q_tiles = S // q_tile

    kernel = functools.partial(
        _self_attention_kernel,
        q_tile=q_tile, scale_inv=1.0 / math.sqrt(float(A)), eps=1e-5)

    est = _vmem_estimate_bytes(S, H, A, q_tile)
    vmem_limit = int(min(max(32 * 2**20, 2 * est), vmem_budget))

    # Constant operands: whole array resident in VMEM, single-buffered.
    vmem_whole = pl.BlockSpec(memory_space=pltpu.MemorySpace.VMEM)

    cost = pl.CostEstimate(
        flops=int(B * (2 * S * H * (A + H)        # K,V projection (once / batch)
                       + 2 * S * H * A            # Q projection (all tiles)
                       + 2 * S * S * A            # energy
                       + 2 * S * S * H            # attn @ V
                       + 10 * S * H)),            # LayerNorm-ish VPU work
        transcendentals=int(B * (S * S + 2 * S)),
        bytes_accessed=int(B * S * H * 4 * 2 + B * S * S * 4
                           + (2 * H * A + H * H) * 2),
    )

    out, attn = pl.pallas_call(
        kernel,
        grid=(B, num_q_tiles),
        in_specs=[
            pl.BlockSpec((1, S, H), lambda b, q: (b, 0, 0)),   # full sequence
            vmem_whole,                                        # wq (bf16)
            vmem_whole,                                        # bq
            vmem_whole,                                        # wk (bf16)
            vmem_whole,                                        # bk
            vmem_whole,                                        # wv (bf16)
            vmem_whole,                                        # bv
            vmem_whole,                                        # gamma
            vmem_whole,                                        # beta
        ],
        out_specs=[
            pl.BlockSpec((1, q_tile, H), lambda b, q: (b, q, 0)),
            pl.BlockSpec((1, q_tile, S), lambda b, q: (b, q, 0)),
        ],
        out_shape=[
            jax.ShapeDtypeStruct((B, S, H), jnp.float32),
            jax.ShapeDtypeStruct((B, S, S), jnp.float32),
        ],
        scratch_shapes=[
            pltpu.VMEM((S, A), jnp.bfloat16),                  # K (per batch)
            pltpu.VMEM((S, H), jnp.bfloat16),                  # V (per batch)
        ],
        compiler_params=pltpu.CompilerParams(
            dimension_semantics=("parallel", "arbitrary"),
            vmem_limit_bytes=vmem_limit),
        cost_estimate=cost,
    )(
        hidden_states,
        params["wq"].astype(jnp.bfloat16), params["bq"],
        params["wk"].astype(jnp.bfloat16), params["bk"],
        params["wv"].astype(jnp.bfloat16), params["bv"],
        params["gamma"], params["beta"],
    )
    return out, attn


def init_params(key, hidden_dim, attention_dim):
    """Deterministic parameter init mirroring the PyTorch module's shapes.

    PyTorch nn.Linear stores weight as (out, in); we store the transpose
    (in, out) so the kernel computes x @ W directly.
    """
    ks = jax.random.split(key, 6)

    def lin(kw, kb, fan_in, fan_out):
        bound = 1.0 / math.sqrt(float(fan_in))
        w = jax.random.uniform(kw, (fan_in, fan_out), jnp.float32, -bound, bound)
        b = jax.random.uniform(kb, (1, fan_out), jnp.float32, -bound, bound)
        return w, b

    wq, bq = lin(ks[0], ks[1], hidden_dim, attention_dim)
    wk, bk = lin(ks[2], ks[3], hidden_dim, attention_dim)
    wv, bv = lin(ks[4], ks[5], hidden_dim, hidden_dim)
    return {
        "wq": wq, "bq": bq,
        "wk": wk, "bk": bk,
        "wv": wv, "bv": bv,
        "gamma": jnp.ones((1, hidden_dim), jnp.float32),   # nn.LayerNorm defaults
        "beta": jnp.zeros((1, hidden_dim), jnp.float32),
    }


def _reference(hidden_states, params, scale):
    """Pure-JAX (f32) reference of the PyTorch forward, for a correctness check."""
    x = hidden_states
    mean = jnp.mean(x, axis=-1, keepdims=True)
    var = jnp.mean((x - mean) ** 2, axis=-1, keepdims=True)
    normed = (x - mean) / jnp.sqrt(var + 1e-5)
    normed = normed * params["gamma"][0] + params["beta"][0]
    q = normed @ params["wq"] + params["bq"][0]
    k = normed @ params["wk"] + params["bk"][0]
    v = normed @ params["wv"] + params["bv"][0]
    energy = jnp.einsum("bqd,bkd->bqk", q, k) / scale
    attn = jax.nn.softmax(energy, axis=-1)
    out = jnp.einsum("bqk,bkd->bqd", attn, v) + x
    return out, attn


if __name__ == "__main__":
    B, S, H = 2, 8, 32          # batch, seq_len, hidden_dim (attention_dim = H)
    key = jax.random.PRNGKey(0)
    kx, kp = jax.random.split(key)
    x = jax.random.normal(kx, (B, S, H), jnp.float32)
    params = init_params(kp, hidden_dim=H, attention_dim=H)

    out, attn = self_attention(x, params)
    jax.block_until_ready((out, attn))

    ref_out, ref_attn = _reference(x, params, math.sqrt(float(H)))
    # bf16 MXU operands -> relaxed (but still tight) tolerances; softmax is exact.
    assert jnp.allclose(out, ref_out, atol=5e-2, rtol=5e-2), \
        float(jnp.max(jnp.abs(out - ref_out)))
    assert jnp.allclose(attn, ref_attn, atol=2e-2, rtol=2e-2), \
        float(jnp.max(jnp.abs(attn - ref_attn)))
    assert jnp.allclose(jnp.sum(attn, axis=-1), 1.0, atol=1e-3)

    print("KERNEL_OK")
</pallas_src>

<mosaic_0001>
module attributes {stable_mosaic.version = 11 : i64} {
  func.func @_self_attention_kernel(%arg0: i32, %arg1: i32, %arg2: memref<1x8x32xf32, #tpu.memory_space<vmem>>, %arg3: memref<32x32xbf16, #tpu.memory_space<vmem>>, %arg4: memref<1x32xf32, #tpu.memory_space<vmem>>, %arg5: memref<32x32xbf16, #tpu.memory_space<vmem>>, %arg6: memref<1x32xf32, #tpu.memory_space<vmem>>, %arg7: memref<32x32xbf16, #tpu.memory_space<vmem>>, %arg8: memref<1x32xf32, #tpu.memory_space<vmem>>, %arg9: memref<1x32xf32, #tpu.memory_space<vmem>>, %arg10: memref<1x32xf32, #tpu.memory_space<vmem>>, %arg11: memref<1x8x32xf32, #tpu.memory_space<vmem>>, %arg12: memref<1x8x8xf32, #tpu.memory_space<vmem>>, %arg13: memref<8x32xbf16, #tpu.memory_space<vmem>>, %arg14: memref<8x32xbf16, #tpu.memory_space<vmem>>) attributes {dimension_semantics = [#tpu.dimension_semantics<parallel>, #tpu.dimension_semantics<arbitrary>], iteration_bounds = array<i64: 2, 1>, scalar_prefetch = 0 : i64, scratch_operands = 2 : i64, tpu.core_type = #tpu.core_type<tc>, window_params = [{transform_indices = @transform_0, window_bounds = array<i64: 1, 8, 32>}, {pipeline_mode = #tpu.pipeline_mode<synchronous>, transform_indices = @transform_1, window_bounds = array<i64: 32, 32>}, {pipeline_mode = #tpu.pipeline_mode<synchronous>, transform_indices = @transform_2, window_bounds = array<i64: 1, 32>}, {pipeline_mode = #tpu.pipeline_mode<synchronous>, transform_indices = @transform_3, window_bounds = array<i64: 32, 32>}, {pipeline_mode = #tpu.pipeline_mode<synchronous>, transform_indices = @transform_4, window_bounds = array<i64: 1, 32>}, {pipeline_mode = #tpu.pipeline_mode<synchronous>, transform_indices = @transform_5, window_bounds = array<i64: 32, 32>}, {pipeline_mode = #tpu.pipeline_mode<synchronous>, transform_indices = @transform_6, window_bounds = array<i64: 1, 32>}, {pipeline_mode = #tpu.pipeline_mode<synchronous>, transform_indices = @transform_7, window_bounds = array<i64: 1, 32>}, {pipeline_mode = #tpu.pipeline_mode<synchronous>, transform_indices = @transform_8, window_bounds = array<i64: 1, 32>}, {transform_indices = @transform_9, window_bounds = array<i64: 1, 8, 32>}, {transform_indices = @transform_10, window_bounds = array<i64: 1, 8, 8>}]} {
    %c0_i32 = arith.constant 0 : i32
    %0 = arith.cmpi eq, %arg1, %c0_i32 : i32
    %1 = arith.extui %0 : i1 to i32
    %c0_i32_0 = arith.constant 0 : i32
    %2 = arith.cmpi ne, %1, %c0_i32_0 : i32
    scf.if %2 {
      %c0_30 = arith.constant 0 : index
      %c0_31 = arith.constant 0 : index
      %c0_32 = arith.constant 0 : index
      %66 = vector.load %arg2[%c0_30, %c0_31, %c0_32] : memref<1x8x32xf32, #tpu.memory_space<vmem>>, vector<1x8x32xf32>
      %67 = vector.shape_cast %66 : vector<1x8x32xf32> to vector<8x32xf32>
      %cst_33 = arith.constant dense<0.000000e+00> : vector<8xf32>
      %68 = vector.multi_reduction <add>, %67, %cst_33 [1] : vector<8x32xf32> to vector<8xf32>
      %69 = vector.shape_cast %68 : vector<8xf32> to vector<8x1xf32>
      %cst_34 = arith.constant 3.200000e+01 : f32
      %70 = vector.broadcast %cst_34 : f32 to vector<8x1xf32>
      %71 = arith.divf %69, %70 : vector<8x1xf32>
      %72 = vector.broadcast %71 : vector<8x1xf32> to vector<8x32xf32>
      %73 = arith.subf %67, %72 : vector<8x32xf32>
      %74 = arith.mulf %73, %73 : vector<8x32xf32>
      %cst_35 = arith.constant dense<0.000000e+00> : vector<8xf32>
      %75 = vector.multi_reduction <add>, %74, %cst_35 [1] : vector<8x32xf32> to vector<8xf32>
      %76 = vector.shape_cast %75 : vector<8xf32> to vector<8x1xf32>
      %cst_36 = arith.constant 3.200000e+01 : f32
      %77 = vector.broadcast %cst_36 : f32 to vector<8x1xf32>
      %78 = arith.divf %76, %77 : vector<8x1xf32>
      %cst_37 = arith.constant 9.99999974E-6 : f32
      %79 = vector.broadcast %cst_37 : f32 to vector<8x1xf32>
      %80 = arith.addf %78, %79 : vector<8x1xf32>
      %81 = math.rsqrt %80 : vector<8x1xf32>
      %82 = vector.broadcast %81 : vector<8x1xf32> to vector<8x32xf32>
      %83 = arith.mulf %73, %82 : vector<8x32xf32>
      %c0_38 = arith.constant 0 : index
      %c0_39 = arith.constant 0 : index
      %84 = vector.load %arg9[%c0_38, %c0_39] : memref<1x32xf32, #tpu.memory_space<vmem>>, vector<1x32xf32>
      %85 = vector.shape_cast %84 : vector<1x32xf32> to vector<32xf32>
      %86 = vector.shape_cast %85 : vector<32xf32> to vector<1x32xf32>
      %87 = vector.broadcast %86 : vector<1x32xf32> to vector<8x32xf32>
      %88 = arith.mulf %83, %87 : vector<8x32xf32>
      %c0_40 = arith.constant 0 : index
      %c0_41 = arith.constant 0 : index
      %89 = vector.load %arg10[%c0_40, %c0_41] : memref<1x32xf32, #tpu.memory_space<vmem>>, vector<1x32xf32>
      %90 = vector.shape_cast %89 : vector<1x32xf32> to vector<32xf32>
      %91 = vector.shape_cast %90 : vector<32xf32> to vector<1x32xf32>
      %92 = vector.broadcast %91 : vector<1x32xf32> to vector<8x32xf32>
      %93 = arith.addf %88, %92 : vector<8x32xf32>
      %94 = arith.truncf %93 : vector<8x32xf32> to vector<8x32xbf16>
      %c0_42 = arith.constant 0 : index
      %c0_43 = arith.constant 0 : index
      %95 = vector.load %arg5[%c0_42, %c0_43] : memref<32x32xbf16, #tpu.memory_space<vmem>>, vector<32x32xbf16>
      %cst_44 = arith.constant dense<0.000000e+00> : vector<8x32xf32>
      %96 = tpu.matmul %94, %95, %cst_44 {dimension_numbers = #tpu.dot_dimension_numbers<[1], [0], [0], [1], [0, 0, 1, 1], [], []>} : vector<8x32xbf16>, vector<32x32xbf16>, vector<8x32xf32> -> vector<8x32xf32>
      %c0_45 = arith.constant 0 : index
      %c0_46 = arith.constant 0 : index
      %97 = vector.load %arg6[%c0_45, %c0_46] : memref<1x32xf32, #tpu.memory_space<vmem>>, vector<1x32xf32>
      %98 = vector.shape_cast %97 : vector<1x32xf32> to vector<32xf32>
      %99 = vector.shape_cast %98 : vector<32xf32> to vector<1x32xf32>
      %100 = vector.broadcast %99 : vector<1x32xf32> to vector<8x32xf32>
      %101 = arith.addf %96, %100 : vector<8x32xf32>
      %102 = arith.truncf %101 : vector<8x32xf32> to vector<8x32xbf16>
      %c0_47 = arith.constant 0 : index
      %c0_48 = arith.constant 0 : index
      %103 = vector.load %arg13[%c0_47, %c0_48] : memref<8x32xbf16, #tpu.memory_space<vmem>>, vector<8x32xbf16>
      tpu.vector_store %arg13[%c0_47, %c0_48], %102 {strides = array<i32>} : memref<8x32xbf16, #tpu.memory_space<vmem>>, vector<8x32xbf16>,
      %c0_49 = arith.constant 0 : index
      %c0_50 = arith.constant 0 : index
      %104 = vector.load %arg7[%c0_49, %c0_50] : memref<32x32xbf16, #tpu.memory_space<vmem>>, vector<32x32xbf16>
      %cst_51 = arith.constant dense<0.000000e+00> : vector<8x32xf32>
      %105 = tpu.matmul %94, %104, %cst_51 {dimension_numbers = #tpu.dot_dimension_numbers<[1], [0], [0], [1], [0, 0, 1, 1], [], []>} : vector<8x32xbf16>, vector<32x32xbf16>, vector<8x32xf32> -> vector<8x32xf32>
      %c0_52 = arith.constant 0 : index
      %c0_53 = arith.constant 0 : index
      %106 = vector.load %arg8[%c0_52, %c0_53] : memref<1x32xf32, #tpu.memory_space<vmem>>, vector<1x32xf32>
      %107 = vector.shape_cast %106 : vector<1x32xf32> to vector<32xf32>
      %108 = vector.shape_cast %107 : vector<32xf32> to vector<1x32xf32>
      %109 = vector.broadcast %108 : vector<1x32xf32> to vector<8x32xf32>
      %110 = arith.addf %105, %109 : vector<8x32xf32>
      %111 = arith.truncf %110 : vector<8x32xf32> to vector<8x32xbf16>
      %c0_54 = arith.constant 0 : index
      %c0_55 = arith.constant 0 : index
      %112 = vector.load %arg14[%c0_54, %c0_55] : memref<8x32xbf16, #tpu.memory_space<vmem>>, vector<8x32xbf16>
      tpu.vector_store %arg14[%c0_54, %c0_55], %111 {strides = array<i32>} : memref<8x32xbf16, #tpu.memory_space<vmem>>, vector<8x32xbf16>,
    } else {
    }
    %c8_i32 = arith.constant 8 : i32
    %3 = arith.muli %arg1, %c8_i32 : i32
    %4 = tpu.assume_multiple %3, 8 : i32
    %c0 = arith.constant 0 : index
    %5 = arith.index_cast %4 : i32 to index
    %c0_1 = arith.constant 0 : index
    %6 = vector.load %arg2[%c0, %5, %c0_1] : memref<1x8x32xf32, #tpu.memory_space<vmem>>, vector<1x8x32xf32>
    %7 = vector.shape_cast %6 : vector<1x8x32xf32> to vector<8x32xf32>
    %cst = arith.constant dense<0.000000e+00> : vector<8xf32>
    %8 = vector.multi_reduction <add>, %7, %cst [1] : vector<8x32xf32> to vector<8xf32>
    %9 = vector.shape_cast %8 : vector<8xf32> to vector<8x1xf32>
    %cst_2 = arith.constant 3.200000e+01 : f32
    %10 = vector.broadcast %cst_2 : f32 to vector<8x1xf32>
    %11 = arith.divf %9, %10 : vector<8x1xf32>
    %12 = vector.broadcast %11 : vector<8x1xf32> to vector<8x32xf32>
    %13 = arith.subf %7, %12 : vector<8x32xf32>
    %14 = arith.mulf %13, %13 : vector<8x32xf32>
    %cst_3 = arith.constant dense<0.000000e+00> : vector<8xf32>
    %15 = vector.multi_reduction <add>, %14, %cst_3 [1] : vector<8x32xf32> to vector<8xf32>
    %16 = vector.shape_cast %15 : vector<8xf32> to vector<8x1xf32>
    %cst_4 = arith.constant 3.200000e+01 : f32
    %17 = vector.broadcast %cst_4 : f32 to vector<8x1xf32>
    %18 = arith.divf %16, %17 : vector<8x1xf32>
    %cst_5 = arith.constant 9.99999974E-6 : f32
    %19 = vector.broadcast %cst_5 : f32 to vector<8x1xf32>
    %20 = arith.addf %18, %19 : vector<8x1xf32>
    %21 = math.rsqrt %20 : vector<8x1xf32>
    %22 = vector.broadcast %21 : vector<8x1xf32> to vector<8x32xf32>
    %23 = arith.mulf %13, %22 : vector<8x32xf32>
    %c0_6 = arith.constant 0 : index
    %c0_7 = arith.constant 0 : index
    %24 = vector.load %arg9[%c0_6, %c0_7] : memref<1x32xf32, #tpu.memory_space<vmem>>, vector<1x32xf32>
    %25 = vector.shape_cast %24 : vector<1x32xf32> to vector<32xf32>
    %26 = vector.shape_cast %25 : vector<32xf32> to vector<1x32xf32>
    %27 = vector.broadcast %26 : vector<1x32xf32> to vector<8x32xf32>
    %28 = arith.mulf %23, %27 : vector<8x32xf32>
    %c0_8 = arith.constant 0 : index
    %c0_9 = arith.constant 0 : index
    %29 = vector.load %arg10[%c0_8, %c0_9] : memref<1x32xf32, #tpu.memory_space<vmem>>, vector<1x32xf32>
    %30 = vector.shape_cast %29 : vector<1x32xf32> to vector<32xf32>
    %31 = vector.shape_cast %30 : vector<32xf32> to vector<1x32xf32>
    %32 = vector.broadcast %31 : vector<1x32xf32> to vector<8x32xf32>
    %33 = arith.addf %28, %32 : vector<8x32xf32>
    %34 = arith.truncf %33 : vector<8x32xf32> to vector<8x32xbf16>
    %c0_10 = arith.constant 0 : index
    %c0_11 = arith.constant 0 : index
    %35 = vector.load %arg3[%c0_10, %c0_11] : memref<32x32xbf16, #tpu.memory_space<vmem>>, vector<32x32xbf16>
    %cst_12 = arith.constant dense<0.000000e+00> : vector<8x32xf32>
    %36 = tpu.matmul %34, %35, %cst_12 {dimension_numbers = #tpu.dot_dimension_numbers<[1], [0], [0], [1], [0, 0, 1, 1], [], []>} : vector<8x32xbf16>, vector<32x32xbf16>, vector<8x32xf32> -> vector<8x32xf32>
    %c0_13 = arith.constant 0 : index
    %c0_14 = arith.constant 0 : index
    %37 = vector.load %arg4[%c0_13, %c0_14] : memref<1x32xf32, #tpu.memory_space<vmem>>, vector<1x32xf32>
    %38 = vector.shape_cast %37 : vector<1x32xf32> to vector<32xf32>
    %39 = vector.shape_cast %38 : vector<32xf32> to vector<1x32xf32>
    %40 = vector.broadcast %39 : vector<1x32xf32> to vector<8x32xf32>
    %41 = arith.addf %36, %40 : vector<8x32xf32>
    %cst_15 = arith.constant 0.176776692 : f32
    %42 = vector.broadcast %cst_15 : f32 to vector<8x32xf32>
    %43 = arith.mulf %41, %42 : vector<8x32xf32>
    %44 = arith.truncf %43 : vector<8x32xf32> to vector<8x32xbf16>
    %c0_16 = arith.constant 0 : index
    %c0_17 = arith.constant 0 : index
    %45 = vector.load %arg13[%c0_16, %c0_17] : memref<8x32xbf16, #tpu.memory_space<vmem>>, vector<8x32xbf16>
    %cst_18 = arith.constant dense<0.000000e+00> : vector<8x8xf32>
    %46 = tpu.matmul %44, %45, %cst_18 {dimension_numbers = #tpu.dot_dimension_numbers<[1], [1], [0], [0], [0, 0, 1, 0], [], []>} : vector<8x32xbf16>, vector<8x32xbf16>, vector<8x8xf32> -> vector<8x8xf32>
    %cst_19 = arith.constant dense<0xFF800000> : vector<8xf32>
    %47 = vector.multi_reduction <maximumf>, %46, %cst_19 [1] : vector<8x8xf32> to vector<8xf32>
    %48 = vector.shape_cast %47 : vector<8xf32> to vector<8x1xf32>
    %49 = vector.broadcast %48 : vector<8x1xf32> to vector<8x8xf32>
    %50 = arith.subf %46, %49 : vector<8x8xf32>
    %51 = math.exp %50 : vector<8x8xf32>
    %cst_20 = arith.constant dense<0.000000e+00> : vector<8xf32>
    %52 = vector.multi_reduction <add>, %51, %cst_20 [1] : vector<8x8xf32> to vector<8xf32>
    %53 = vector.shape_cast %52 : vector<8xf32> to vector<8x1xf32>
    %54 = vector.broadcast %53 : vector<8x1xf32> to vector<8x8xf32>
    %55 = arith.divf %51, %54 : vector<8x8xf32>
    %56 = arith.truncf %55 : vector<8x8xf32> to vector<8x8xbf16>
    %c0_21 = arith.constant 0 : index
    %c0_22 = arith.constant 0 : index
    %57 = vector.load %arg14[%c0_21, %c0_22] : memref<8x32xbf16, #tpu.memory_space<vmem>>, vector<8x32xbf16>
    %cst_23 = arith.constant dense<0.000000e+00> : vector<8x32xf32>
    %58 = tpu.matmul %56, %57, %cst_23 {dimension_numbers = #tpu.dot_dimension_numbers<[1], [0], [0], [1], [0, 0, 1, 1], [], []>} : vector<8x8xbf16>, vector<8x32xbf16>, vector<8x32xf32> -> vector<8x32xf32>
    %59 = arith.addf %58, %7 : vector<8x32xf32>
    %c0_24 = arith.constant 0 : index
    %c0_25 = arith.constant 0 : index
    %c0_26 = arith.constant 0 : index
    %60 = vector.load %arg11[%c0_24, %c0_25, %c0_26] : memref<1x8x32xf32, #tpu.memory_space<vmem>>, vector<1x8x32xf32>
    %61 = vector.shape_cast %60 : vector<1x8x32xf32> to vector<8x32xf32>
    %62 = vector.shape_cast %59 : vector<8x32xf32> to vector<1x8x32xf32>
    tpu.vector_store %arg11[%c0_24, %c0_25, %c0_26], %62 {strides = array<i32>} : memref<1x8x32xf32, #tpu.memory_space<vmem>>, vector<1x8x32xf32>,
    %c0_27 = arith.constant 0 : index
    %c0_28 = arith.constant 0 : index
    %c0_29 = arith.constant 0 : index
    %63 = vector.load %arg12[%c0_27, %c0_28, %c0_29] : memref<1x8x8xf32, #tpu.memory_space<vmem>>, vector<1x8x8xf32>
    %64 = vector.shape_cast %63 : vector<1x8x8xf32> to vector<8x8xf32>
    %65 = vector.shape_cast %55 : vector<8x8xf32> to vector<1x8x8xf32>
    tpu.vector_store %arg12[%c0_27, %c0_28, %c0_29], %65 {strides = array<i32>} : memref<1x8x8xf32, #tpu.memory_space<vmem>>, vector<1x8x8xf32>,
    return
  }
  func.func @transform_0(%arg0: i32, %arg1: i32) -> (i32, i32, i32) {
    %c0_i32 = arith.constant 0 : i32
    %c0_i32_0 = arith.constant 0 : i32
    %c0_i32_1 = arith.constant 0 : i32
    return %arg0, %c0_i32, %c0_i32_0 : i32, i32, i32
  }
  func.func @transform_1(%arg0: i32, %arg1: i32) -> (i32, i32) {
    %c0_i32 = arith.constant 0 : i32
    %c0_i32_0 = arith.constant 0 : i32
    %c0_i32_1 = arith.constant 0 : i32
    return %c0_i32, %c0_i32_0 : i32, i32
  }
  func.func @transform_2(%arg0: i32, %arg1: i32) -> (i32, i32) {
    %c0_i32 = arith.constant 0 : i32
    %c0_i32_0 = arith.constant 0 : i32
    %c0_i32_1 = arith.constant 0 : i32
    return %c0_i32, %c0_i32_0 : i32, i32
  }
  func.func @transform_3(%arg0: i32, %arg1: i32) -> (i32, i32) {
    %c0_i32 = arith.constant 0 : i32
    %c0_i32_0 = arith.constant 0 : i32
    %c0_i32_1 = arith.constant 0 : i32
    return %c0_i32, %c0_i32_0 : i32, i32
  }
  func.func @transform_4(%arg0: i32, %arg1: i32) -> (i32, i32) {
    %c0_i32 = arith.constant 0 : i32
    %c0_i32_0 = arith.constant 0 : i32
    %c0_i32_1 = arith.constant 0 : i32
    return %c0_i32, %c0_i32_0 : i32, i32
  }
  func.func @transform_5(%arg0: i32, %arg1: i32) -> (i32, i32) {
    %c0_i32 = arith.constant 0 : i32
    %c0_i32_0 = arith.constant 0 : i32
    %c0_i32_1 = arith.constant 0 : i32
    return %c0_i32, %c0_i32_0 : i32, i32
  }
  func.func @transform_6(%arg0: i32, %arg1: i32) -> (i32, i32) {
    %c0_i32 = arith.constant 0 : i32
    %c0_i32_0 = arith.constant 0 : i32
    %c0_i32_1 = arith.constant 0 : i32
    return %c0_i32, %c0_i32_0 : i32, i32
  }
  func.func @transform_7(%arg0: i32, %arg1: i32) -> (i32, i32) {
    %c0_i32 = arith.constant 0 : i32
    %c0_i32_0 = arith.constant 0 : i32
    %c0_i32_1 = arith.constant 0 : i32
    return %c0_i32, %c0_i32_0 : i32, i32
  }
  func.func @transform_8(%arg0: i32, %arg1: i32) -> (i32, i32) {
    %c0_i32 = arith.constant 0 : i32
    %c0_i32_0 = arith.constant 0 : i32
    %c0_i32_1 = arith.constant 0 : i32
    return %c0_i32, %c0_i32_0 : i32, i32
  }
  func.func @transform_9(%arg0: i32, %arg1: i32) -> (i32, i32, i32) {
    %c0_i32 = arith.constant 0 : i32
    %c0_i32_0 = arith.constant 0 : i32
    return %arg0, %arg1, %c0_i32 : i32, i32, i32
  }
  func.func @transform_10(%arg0: i32, %arg1: i32) -> (i32, i32, i32) {
    %c0_i32 = arith.constant 0 : i32
    %c0_i32_0 = arith.constant 0 : i32
    return %arg0, %arg1, %c0_i32 : i32, i32, i32
  }
}

</mosaic_0001>

<bundles_post_ra>
// kernel: tpu_custom_call.1
= control target key start
LH: loop header
LB: loop body
LE: loop exit
PB: predicated region body
PF: predicated region fallthrough
CT: control target
= control target key end

     0   :  { %s1773_s0 = inlined_call_operand.hbm [shape: f32[2,8,32], index: 0, kind: input, shape index: {}]   ;;  %s1774_s1 = inlined_call_operand.hbm [shape: bf16[32,32], index: 1, kind: input, shape index: {}]   ;;  %s1775_s2 = inlined_call_operand.vmem [shape: f32[1,32], index: 2, kind: input, shape index: {}]   ;;  %s1776_s3 = inlined_call_operand.hbm [shape: bf16[32,32], index: 3, kind: input, shape index: {}]   ;;  %s1777_s4 = inlined_call_operand.vmem [shape: f32[1,32], index: 4, kind: input, shape index: {}]   ;;  %s1778_s5 = inlined_call_operand.vmem [shape: bf16[32,32], index: 5, kind: input, shape index: {}]   ;;  %s1779_s6 = inlined_call_operand.vmem [shape: f32[1,32], index: 6, kind: input, shape index: {}]   ;;  %s1780_s7 = inlined_call_operand.vmem [shape: f32[1,32], index: 7, kind: input, shape index: {}]   ;;  %s1781_s8 = inlined_call_operand.vmem [shape: f32[1,32], index: 8, kind: input, shape index: {}]   ;;  %s1782_s9 = inlined_call_operand.hbm [shape: f32[2,8,32], index: 9, kind: output, shape index: {0}]   ;;  %s1783_s10 = inlined_call_operand.hbm [shape: f32[2,8,8], index: 10, kind: output, shape index: {1}]  }
   0x1   :  { %1794 = sst [smem:[#allocation20_spill]] %s1782_s9 }
   0x2   :  { %1795 = sst [smem:[#allocation21_spill]] %s1783_s10 }
   0x3   :  { %16 = vsyncpa [#allocation5], 0 }
   0x4   :  { %18 = vsyncpa [#allocation5 + $0x1], 0 }
   0x5   :  { %19 = vsyncpa [#allocation8], 0 }
   0x6   :  { %20 = vsyncpa [#allocation6], 0 }
   0x7   :  { %22 = vsyncpa [#allocation6 + $0x1], 0 }
   0x8   :  { %23 = vsyncpa [#allocation12], 0 }
   0x9   :  { %25 = vsyncpa [#allocation12 + $0x1], 0  ;;  %s1446_s13 = smov 0   ;;  %s1448_s14 = smov 0  }
   0xa   :  { %s1450_s15 = smov 0   ;;  %s1452_s16 = smov 0  }
   0xb   :  { %s1454_s17 = smov 0   ;;  %s1456_s18 = smov 0  }
   0xc LB: > { %1796 = sst [smem:[#allocation17_spill]] %s1360_s13  ;;  %s983_s19 = sadd.s32 4294967295, %s1380_s18   ;;  %s1380_s18 = sphi %s1456_s18, %s31_s18   ;;  %s1376_s17 = sphi %s1454_s17, %s1823_s17   ;;  %s1372_s16 = sphi %s1452_s16, %s1822_s16   ;;  %s1368_s15 = sphi %s1450_s15, %s1821_s15   ;;  %s1364_s14 = sphi %s1448_s14, %s1820_s14   ;;  %s1360_s13 = sphi %s1446_s13, %s1819_s13  }
   0xd   : > { %1797 = sst [smem:[#allocation18_spill]] %s1372_s16  ;;  %s984_s20 = sadd.s32 4294967294, %s1380_s18  }
   0xe   : > { %p63_p0 = scmp.ne.s32.totalorder %s1364_s14, %s1360_s13  ;;  %p1480_p1 = scmp.eq.s32.totalorder %s983_s19, 0 }
   0xf   : > { %p1484_p2 = scmp.eq.s32.totalorder %s983_s19, 1  ;;  %p263_p3 = scmp.eq.s32.totalorder %s984_s20, 1 }
  0x10   : > { %s1798_s21 = scalar_select %p1480_p1, 1, 0 }
  0x11   : > { %p1490_p4 = por %p1480_p1, %p63_p0  ;;  %p985_p5 = scmp.ge.s32.totalorder %s1380_s18, 1 }
  0x12   : > { %p1495_p6 = por %p263_p3, %p63_p0  ;;  %p298_p7 = scmp.lt.s32.totalorder %s1380_s18, 3 }
  0x13   : > { %s1800_s23 = scalar_select %p1490_p4, 1, 0 }
  0x14   : > { %s1801_s24 = scalar_select %p1495_p6, 1, 0 }
  0x15   : > { %p1500_p8 = pnand %p985_p5, %p298_p7  ;;  %s1382_s26 = smov [#allocation7]  }
  0x16   : > { %1802 = sst [smem:[#allocation19_spill]] %s1801_s24  ;;  %s310_s27 = sshll.u32 %s1382_s26, 4  ;;  %s1504_s27 = int_to_ptr.vmem [resolvable:$true] %s310_s27 }
  0x17   : > { %p1084_p9 = pneg %p1500_p8  ;;  %s1383_s29 = smov [#allocation9]  }
  0x18   : > { %s326_s30 = sshll.u32 %s1383_s29, 4  ;;  %s1176_s19 = scalar_lea.hbm %s1774_s1, 256  ;;  %s1515_s30 = int_to_ptr.vmem [resolvable:$true] %s326_s30 }
  0x19   : > { %p1511_p11 = pnand %p1084_p9, %p1480_p1  ;;  %p1177_p12 = scmp.ne.s32.totalorder %s1774_s1, %s1176_s19 }
  0x1a   : > { %p1183_p5 = scmp.lt.u32.totalorder %s1176_s19, %s1774_s1 }
  0x1b   : > { %p1178_p13 = pneg %p1511_p11 }
  0x1d   : > { %p1179_p0 = pnand %p1178_p13, %p1177_p12 }
  0x1f   : > { %p1180_p3 = pneg %p1179_p0 }
  0x21   : > { %p1185_p7 = pnand %p1183_p5, %p1180_p3 }
  0x23   : > { %1188 = shalt.err (!%p1185_p7)
}
  0x24   : > { %s1189_s29 = scalar_lea.vmem %s1504_s27, 256  ;;  %p1197_p1 = scmp.lt.s32.totalorder %s1504_s27, %s1504_s27 }
  0x25   : > { %p1190_p9 = scmp.ne.s32.totalorder %s1504_s27, %s1189_s29  ;;  %p1198_p12 = scmp.lt.s32.totalorder %s1189_s29, %s1189_s29 }
  0x27   : > { %p1192_p10 = pnand %p1190_p9, %p1178_p13  ;;  %p1199_p0 = por %p1198_p12, %p1197_p1 }
  0x29   : > { %p1193_p6 = pneg %p1192_p10 }
  0x2b   : > { %p1200_p4 = pnand %p1199_p0, %p1193_p6 }
  0x2d   : > { %1203 = shalt.err (!%p1200_p4)
}
  0x2e   : > { %s1384_s13 = smov 64   ;;  %s1385_s24 = smov 4  }
  0x2f   : > { %1087 = dma.hbm_to_vmem [thread:$0]  (!%p1511_p11), %s1774_s1, 256, %s1504_s27, [#allocation8], %s1384_s13, %s1384_s13, %s1385_s24  }
  0x30   : > { %s1204_s26 = scalar_lea.hbm %s1776_s3, 256 }
  0x31   : > { %p1205_p1 = scmp.ne.s32.totalorder %s1776_s3, %s1204_s26  ;;  %p1211_p10 = scmp.lt.u32.totalorder %s1204_s26, %s1776_s3 }
  0x33   : > { %p1207_p4 = pnand %p1205_p1, %p1178_p13 }
  0x35   : > { %p1208_p6 = pneg %p1207_p4 }
  0x37   : > { %p1213_p3 = pnand %p1211_p10, %p1208_p6 }
  0x39   : > { %1216 = shalt.err (!%p1213_p3)
}
  0x3a   : > { %s1217_s27 = scalar_lea.vmem %s1515_s30, 256  ;;  %p1225_p12 = scmp.lt.s32.totalorder %s1515_s30, %s1515_s30 }
  0x3b   : > { %p1218_p5 = scmp.ne.s32.totalorder %s1515_s30, %s1217_s27  ;;  %p1226_p0 = scmp.lt.s32.totalorder %s1217_s27, %s1217_s27 }
  0x3d   : > { %p1220_p7 = pnand %p1218_p5, %p1178_p13  ;;  %p1227_p1 = por %p1226_p0, %p1225_p12 }
  0x3f   : > { %p1221_p9 = pneg %p1220_p7 }
  0x41   : > { %p1228_p4 = pnand %p1227_p1, %p1221_p9 }
  0x43   : > { %1231 = shalt.err (!%p1228_p4)
}
  0x44   : > { %1090 = dma.hbm_to_vmem [thread:$0]  (!%p1511_p11), %s1776_s3, 256, %s1515_s30, [#allocation8], %s1384_s13, %s1384_s13, %s1385_s24  }
  0x45   : > { %s43_s16 = sadd.s32 1, %s1376_s17  ;;  %s50_s11 = sadd.s32 1, %s1368_s15 }
  0x46   : > { %p45_p13 = scmp.ge.s32.totalorder %s43_s16, 2  ;;  %p57_p6 = scmp.ne.s32.totalorder %s1368_s15, %s1364_s14 }
  0x47   : > { %p58_p10 = scmp.eq.s32.totalorder %s1380_s18, 0  ;;  %p1104_p3 = scmp.lt.s32.totalorder %s1380_s18, 2 }
  0x48   : > { %s1825_s16 = smov (%p45_p13, %s43_s16), 0  ;;  %p1579_p7 = por %p1484_p2, %p57_p6 }
  0x49   : > { %p59_p5 = por %p58_p10, %p57_p6  ;;  %s47_s12 = ssub.s32 %s1376_s17, %s1825_s16 }
  0x4a   : > { %s1805_s28 = scalar_select %p1579_p7, 1, 0 }
  0x4b   : > { %s355_s19 = sand.u32 1, %s1368_s15   ;;  %p48_p9 = scmp.eq.s32.totalorder %s47_s12, 0 }
  0x4c   : > { %s989_s30 = sshll.u32 %s355_s19, 3  ;;  %s990_s13 = sshll.u32 %s1376_s17, 7 }
  0x4d   : > { %s1588_s24 = scalar_select %p48_p9, %s1368_s15, %s50_s11  }
  0x4e   : > { %s1593_s29 = scalar_lea.hbm %s1773_s0, %s990_s13  ;;  %s359_s22 = scalar_lea.vmem [#allocation4], %s989_s30 }
  0x4f   : > { %s366_s27 = sshll.u32 %s359_s22, 4  ;;  %p1597_p2 = pnand %p1104_p3, %p59_p5  ;;  %s1601_s27 = int_to_ptr.vmem [resolvable:$true] %s366_s27 }
  0x50   : > { %s356_s10 = scalar_lea.sflag [#allocation5], %s355_s19  ;;  %s1232_s11 = scalar_lea.hbm %s1593_s29, 128 }
  0x51   : > { %p1233_p11 = scmp.ne.s32.totalorder %s1593_s29, %s1232_s11  ;;  %p1234_p12 = pneg %p1597_p2 }
  0x52   : > { %s1237_s13 = scalar_lea.hbm %s1773_s0, 256  ;;  %p1238_p4 = scmp.lt.u32.totalorder %s1593_s29, %s1773_s0 }
  0x53   : > { %p1235_p0 = pnand %p1234_p12, %p1233_p11  ;;  %p1239_p13 = scmp.lt.u32.totalorder %s1237_s13, %s1232_s11 }
  0x54   : > { %p1241_p10 = scmp.lt.u32.totalorder %s1232_s11, %s1593_s29 }
  0x55   : > { %p1236_p1 = pneg %p1235_p0  ;;  %p1240_p6 = por %p1239_p13, %p1238_p4 }
  0x57   : > { %p1242_p3 = por %p1241_p10, %p1240_p6 }
  0x59   : > { %p1243_p5 = pnand %p1242_p3, %p1236_p1 }
  0x5b   : > { %1246 = shalt.err (!%p1243_p5)
}
  0x5c   : > { %s1247_s19 = scalar_lea.vmem %s1601_s27, 128  ;;  %s1386_s22 = smov [#allocation4]  }
  0x5d   : > { %p1248_p9 = scmp.ne.s32.totalorder %s1601_s27, %s1247_s19  ;;  %s1252_s12 = sshll.u32 %s1386_s22, 4  ;;  %s1253_s12 = int_to_ptr.vmem [resolvable:$false] %s1252_s12 }
  0x5e   : > { %s1254_s30 = scalar_lea.vmem %s1253_s12, 256  ;;  %p1255_p7 = scmp.lt.s32.totalorder %s1601_s27, %s1253_s12 }
  0x5f   : > { %p1250_p11 = pnand %p1248_p9, %p1234_p12  ;;  %p1256_p4 = scmp.lt.s32.totalorder %s1254_s30, %s1247_s19 }
  0x61   : > { %p1251_p0 = pneg %p1250_p11  ;;  %p1257_p13 = por %p1256_p4, %p1255_p7 }
  0x63   : > { %p1258_p6 = pnand %p1257_p13, %p1251_p0 }
  0x65   : > { %1261 = shalt.err (!%p1258_p6)
}
  0x66   : > { %1094 = dma.hbm_to_vmem [thread:$0]  (!%p1597_p2), %s1593_s29, 128, %s1601_s27, %s356_s10  }
  0x67   : > { %375 = sbr.rel (%p1500_p8) target bundleno = 1418 (0x58a), region = 56  ;;  %s1631_s11 = sand.u32 (!%p1500_p8), 1, %s1364_s14  }
  0x68   : > { %s1634_s13 = sshll.u32 (!%p1500_p8), %s1631_s11, 3  ;;  %s378_s20 = scalar_lea.sflag (!%p1500_p8), [#allocation5], %s1631_s11 }
  0x69   : > { %s381_s26 = scalar_lea.vmem (!%p1500_p8), [#allocation4], %s1634_s13  ;;  %p1807_p7 = scmp.ne.s32.totalorder (!%p1500_p8), %s1800_s23, 0 }
  0x6e   : > { %1343 = dma.done.wait (%p1807_p7), %s378_s20, 128  }
  0x6f   : > { %1345 = vsyncadd (%p1807_p7), %s378_s20, 4294967168  ;;  %p1808_p2 = scmp.ne.s32.totalorder %s1798_s21, 0 }
  0x71   : > { %1347 = dma.done.wait (%p1808_p2), [#allocation8], 512  }
  0x72   : > { %1349 = vsyncadd (%p1808_p2), [#allocation8], 4294966784  ;;  %vm437_vm0 = vcmask 261120   ;;  %v1646_v0 = vld [vmem:[%s381_s26] sm:$0xff]  ;;  %v1163_v13 = vld [vmem:[%s1778_s5] sm:$0xff]   ;;  %v1387_v14 = vmov 0.0  }
  0x73   : > { %v438_v1 = vsel %vm437_vm0, %v1646_v0, 0.0  ;;  %v1162_v12 = vld [vmem:[#allocation9] sm:$0xff]   ;;  %1034 = vmatprep.subr.bf16.mxu0 %v1387_v14  ;;  %1042 = vmatprep.subr.bf16.mxu1 %v1387_v14  ;;  %v1164_v15 = vld [vmem:[#allocation9 + $0x8] sm:$0xff]   ;;  %vm1388_vm1 = vmmov 0   ;;  %v997_v24 = vld [vmem:[%s1780_s7] ss:$0 sm:$0xff] }
  0x74   : > { %439 = vadd.xlane.f32.xlu0 %v438_v1  ;;  %1035 = vmatpush3.bf16.msra.mxu0 %v1162_v12  ;;  %v1165_v16 = vld [vmem:[%s1778_s5 + $0x8] sm:$0xff]   ;;  %v998_v26 = vld [vmem:[%s1781_s8] ss:$0 sm:$0xff]  ;;  %v1166_v31 = vld [vmem:[#allocation7] sm:$0xff]   ;;  %vm536_vm2 = vcmask 257024   ;;  %vm770_vm3 = vcmask 1043456  }
  0x75   : > { %1043 = vmatpush3.bf16.msra.mxu1 %v1163_v13  ;;  %1036 = vmatprep.subr.bf16.mxu0 %v1387_v14  ;;  %v1167_v34 = vld [vmem:[#allocation7 + $0x8] sm:$0xff]   ;;  %vm753_vm4 = vcmask 64512   ;;  %s1809_s23 = sld [smem:[#allocation18_spill]]  ;;  %s430_s25 = scalar_lea.vmem [#allocation11], %s1634_s13 }
  0x76   : > { %1044 = vmatprep.subr.bf16.mxu1 %v1387_v14  ;;  %1038 = vmatprep.mubr.msk.bf16.mxu0 %vm1388_vm1, %v1387_v14  ;;  %v999_v37 = vld [vmem:[%s1777_s4] ss:$0 sm:$0xff]  ;;  %s1810_s10 = sld [smem:[#allocation21_spill]]  ;;  %s850_s22 = sshll.u32 %s430_s25, 4  ;;  %s851_s22 = int_to_ptr.vmem [resolvable:$true] %s850_s22 }
  0x77   : > { %1046 = vmatprep.mubr.msk.bf16.mxu1 %vm1388_vm1, %v1387_v14  ;;  %v1003_v38 = vld [vmem:[%s1779_s6] ss:$0 sm:$0xff]  ;;  %s822_s12 = scalar_lea.sflag [#allocation12], %s1631_s11  ;;  %s1262_s30 = scalar_lea.vmem %s851_s22, 128 }
  0x78   : > { %608 = vadd.xlane.f32.xlu0 %v438_v1  ;;  %1037 = vmatpush3.bf16.msra.mxu0 %v1164_v15  ;;  %v1009_v51 = vld [vmem:[%s1775_s2] ss:$0 sm:$0xff]  ;;  %p1263_p8 = scmp.ne.s32.totalorder %s851_s22, %s1262_s30  ;;  %p1811_p12 = scmp.ne.s32.totalorder %s1805_s28, 0 }
  0x79   : > { %1045 = vmatpush3.bf16.msra.mxu1 %v1165_v16  ;;  %1050 = vmatprep.subr.bf16.mxu0 %v1387_v14  ;;  %s1389_s20 = smov [#allocation11]  }
  0x7a   : > { %1058 = vmatprep.subr.bf16.mxu1 %v1387_v14  ;;  %p1264_p1 = pnand %p1263_p8, %p1811_p12  ;;  %s1266_s26 = sshll.u32 %s1389_s20, 4  ;;  %s1267_s26 = int_to_ptr.vmem [resolvable:$false] %s1266_s26 }
  0x7b   : > { %s1793_s29 = sshll.u32 %s1809_s23, 7  ;;  %s1268_s21 = scalar_lea.vmem %s1267_s26, 256 }
  0x7c   : > { %s1696_s19 = scalar_lea.hbm %s1810_s10, %s1793_s29  ;;  %p1265_p10 = pneg %p1264_p1 }
  0x7d   : > { %p1269_p3 = scmp.lt.s32.totalorder %s851_s22, %s1267_s26  ;;  %p1270_p5 = scmp.lt.s32.totalorder %s1268_s21, %s1262_s30 }
  0x7f   : > { %p1271_p9 = por %p1270_p5, %p1269_p3 }
  0x81   : > { %p1272_p11 = pnand %p1271_p9, %p1265_p10 }
 0x101   : > { %v440_v2 = vpop.xlane.xlu0 %439 }
 0x102   : > { %v442_v3 = vmul.f32 0.03125, %v440_v2 }
 0x104   : > { %v443_v4 = vsub.f32 %v1646_v0, %v442_v3 }
 0x105   : > { %v609_v5 = vpop.xlane.xlu0 %608 }
 0x106   : > { %v611_v6 = vmul.f32 0.03125, %v609_v5  ;;  %v444_v7 = vmul.f32 %v443_v4, %v443_v4 }
 0x108   : > { %v612_v8 = vsub.f32 %v1646_v0, %v611_v6  ;;  %v445_v9 = vsel %vm437_vm0, %v444_v7, 0.0 }
 0x109   : > { %446 = vadd.xlane.f32.xlu1 %v445_v9 }
 0x10a   : > { %v613_v10 = vmul.f32 %v612_v8, %v612_v8 }
 0x10c   : > { %v614_v11 = vsel %vm437_vm0, %v613_v10, 0.0 }
 0x10d   : > { %615 = vadd.xlane.f32.xlu1 %v614_v11 }
 0x196   : > { %v447_v17 = vpop.xlane.xlu1 %446 }
 0x197   : > { %v448_v18 = vmul.f32 0.03125, %v447_v17 }
 0x199   : > { %v449_v19 = vadd.f32 1e-05, %v448_v18 }
 0x19a   : > { %v616_v20 = vpop.xlane.xlu1 %615 }
 0x19b   : > { %1168 = vrsqrt.f32 %v449_v19  ;;  %v617_v21 = vmul.f32 0.03125, %v616_v20 }
 0x19d   : > { %v618_v22 = vadd.f32 1e-05, %v617_v21 }
 0x19f   : > { %1170 = vrsqrt.f32 %v618_v22 }
 0x1a5   : > { %v1169_v23 = vpop.eup %1168 }
 0x1a6   : > { %v451_v25 = vmul.f32 %v1169_v23, %v443_v4 }
 0x1a8   : > { %v459_v27 = vmul.f32 %v997_v24, %v451_v25 }
 0x1a9   : > { %v1171_v28 = vpop.eup %1170 }
 0x1aa   : > { %v620_v29 = vmul.f32 %v1171_v28, %v612_v8  ;;  %v467_v30 = vadd.f32 %v998_v26, %v459_v27 }
 0x1ac   : > { %v468_v32 = vpack.c.bf16 %v467_v30, %v467_v30  ;;  %v628_v33 = vmul.f32 %v997_v24, %v620_v29 }
 0x1ae   : > { %1039 = vmatmul.mubr.msk.bf16.vlgmr.msra.gmra.mrb[0].mxu0 %vm437_vm0, %v468_v32  ;;  %1047 = vmatmul.mubr.msk.bf16.vlgmr.msra.gmra.mrb[0].mxu1 %vm437_vm0, %v468_v32  ;;  %v636_v35 = vadd.f32 %v998_v26, %v628_v33 }
 0x1af   : > { %1051 = vmatpush3.bf16.msra.mxu0 %v1166_v31  ;;  %1054 = vmatprep.mubr.msk.bf16.mxu0 %vm1388_vm1, %v1387_v14 }
 0x1b0   : > { %1052 = vmatprep.subr.bf16.mxu0 %v1387_v14  ;;  %1060 = vmatprep.mubr.msk.bf16.mxu1 %vm1388_vm1, %v1387_v14  ;;  %v637_v36 = vpack.c.bf16 %v636_v35, %v636_v35 }
 0x1b3   : > { %1053 = vmatpush3.bf16.msra.mxu0 %v1167_v34 }
 0x1b4   : > { %1064 = vmatprep.subr.bf16.mxu0 %v1387_v14 }
 0x1b6   : > { %1055 = vmatmul.mubr.msk.bf16.vlgmr.msra.gmra.mrb[4].mxu0 %vm437_vm0, %v637_v36 }
 0x1b7   : > { %1066 = vmatprep.mubr.msk.bf16.mxu0 %vm1388_vm1, %v1387_v14 }
 0x281   : > { %v529_v39 = vpop.f32.mrb[0].mxu0  ;;  %v595_v40 = vpop.f32.mrb[0].mxu1 }
 0x282   : > { %v530_v41 = vadd.f32 %v999_v37, %v529_v39  ;;  %v596_v42 = vadd.f32 %v1003_v38, %v595_v40  ;;  %v1040_v43 = vpop.f32.mrb[1].mxu0  ;;  %v1048_v44 = vpop.f32.mrb[1].mxu1 }
 0x283   : > { %v532_v45 = vpop.f32.mrb[2].mxu0  ;;  %v598_v46 = vpop.f32.mrb[2].mxu1 }
 0x284   : > { %v535_v47 = vpack.c.bf16 %v530_v41, %v530_v41  ;;  %v601_v48 = vpack.c.bf16 %v596_v42, %v596_v42  ;;  %v1041_v49 = vpop.f32.mrb[3].mxu0  ;;  %v1049_v50 = vpop.f32.mrb[3].mxu1 }
 0x286   : > { %537 = vst.msk [vmem:[#allocation2] sm:$0xf] %vm536_vm2, %v535_v47  ;;  %602 = vst.msk [vmem:[#allocation3] sm:$0xf] %vm536_vm2, %v601_v48 }
 0x289   : > { %v698_v52 = vpop.f32.mrb[4].mxu0 }
 0x28a   : > { %v1056_v53 = vpop.f32.mrb[5].mxu0  ;;  %v699_v55 = vadd.f32 %v1009_v51, %v698_v52 }
 0x28b   : > { %v701_v54 = vpop.f32.mrb[6].mxu0 }
 0x28c   : > { %v1057_v56 = vpop.f32.mrb[7].mxu0  ;;  %v704_v61 = vmul.f32 0.17677669, %v699_v55 }
 0x28d   : > { %v706_v57 = vld [vmem:[#allocation2] sm:$0xf]  ;;  %v766_v58 = vld [vmem:[#allocation3] sm:$0xf] }
 0x28e   : > { %v711_v59 = vsel %vm437_vm0, %v706_v57, 0  ;;  %v772_v60 = vsel %vm770_vm3, %v766_v58, 0  ;;  %v705_v62 = vpack.c.bf16 %v704_v61, %v704_v61 }
 0x28f   : > { %1059 = vmatpush3.bf16.xpose.msra.mxu1 %v711_v59  ;;  %1065 = vmatpush3.bf16.msra.mxu0 %v772_v60 }
 0x296   : > { %1061 = vmatmul.mubr.msk.bf16.vlgmr.msra.gmra.mrb[4].mxu1 %vm437_vm0, %v705_v62 }
 0x369   : > { %v747_v63 = vpop.f32.mrb[4].mxu1 }
 0x36a   : > { %v1062_v1 = vpop.f32.mrb[5].mxu1  ;;  %v754_v2 = vsel %vm753_vm4, %v747_v63, -inf }
 0x36b   : > { %755 = vmax.xlane.f32.xlu0 %v754_v2  ;;  %v750_v3 = vpop.f32.mrb[6].mxu1 }
 0x36c   : > { %v1063_v4 = vpop.f32.mrb[7].mxu1 }
 0x3f8   : > { %v756_v5 = vpop.xlane.xlu0 %755 }
 0x3f9   : > { %v757_v6 = vsub.f32 %v747_v63, %v756_v5 }
 0x3fb   : > { %v758_v7 = vmul.f32 1.442695, %v757_v6 }
 0x3fd   : > { %1172 = vpow2.f32 %v758_v7 }
 0x407   : > { %v1173_v8 = vpop.eup %1172 }
 0x408   : > { %v760_v9 = vsel %vm753_vm4, %v1173_v8, 0.0 }
 0x409   : > { %761 = vadd.xlane.f32.xlu1 %v760_v9 }
 0x496   : > { %v762_v10 = vpop.xlane.xlu1 %761 }
 0x497   : > { %1174 = vrcp.f32 %v762_v10 }
 0x4a1   : > { %v1175_v11 = vpop.eup %1174 }
 0x4a2   : > { %v764_v12 = vmul.f32 %v1175_v11, %v1173_v8 }
 0x4a4   : > { %v765_v13 = vpack.c.bf16 %v764_v12, %v764_v12  ;;  %815 = vst.msk [vmem:[%s430_s25] sm:$0xff] %vm753_vm4, %v764_v12 }
 0x4a6   : > { %1067 = vmatmul.mubr.msk.bf16.vlgmr.msra.gmra.mrb[8].mxu0 %vm753_vm4, %v765_v13 }
 0x4a7   : > { %1275 = shalt.err (!%p1272_p11)
}
 0x4a8   : > { %s1276_s25 = scalar_lea.hbm %s1696_s19, 128  ;;  %s1280_s20 = scalar_lea.hbm %s1810_s10, 256 }
 0x4a9   : > { %p1277_p0 = scmp.ne.s32.totalorder %s1696_s19, %s1276_s25  ;;  %p1281_p6 = scmp.lt.u32.totalorder %s1696_s19, %s1810_s10 }
 0x4aa   : > { %p1282_p7 = scmp.lt.u32.totalorder %s1280_s20, %s1276_s25  ;;  %p1284_p8 = scmp.lt.u32.totalorder %s1276_s25, %s1696_s19 }
 0x4ab   : > { %p1278_p4 = pnand %p1277_p0, %p1811_p12 }
 0x4ac   : > { %p1283_p2 = por %p1282_p7, %p1281_p6 }
 0x4ad   : > { %p1279_p13 = pneg %p1278_p4 }
 0x4ae   : > { %p1285_p1 = por %p1284_p8, %p1283_p2 }
 0x4b0   : > { %p1286_p10 = pnand %p1285_p1, %p1279_p13 }
 0x4b2   : > { %1289 = shalt.err (!%p1286_p10)
}
 0x4b3   : > { %1081 = dma.vmem_to_hbm [thread:$0]  (%p1811_p12), %s851_s22, 128, %s1696_s19, %s822_s12  }
 0x4b4   : > { %s423_s30 = scalar_lea.vmem [#allocation10], %s1634_s13  ;;  %s1812_s29 = sshll.u32 %s1809_s23, 7 }
 0x4b5   : > { %s836_s21 = sshll.u32 %s423_s30, 4  ;;  %s1813_s9 = sld [smem:[#allocation20_spill]]  ;;  %s1725_s21 = int_to_ptr.vmem [resolvable:$true] %s836_s21 }
 0x4b6   : > { %s817_s13 = scalar_lea.sflag [#allocation6], %s1631_s11  ;;  %s1290_s19 = scalar_lea.vmem %s1725_s21, 128 }
 0x4b7   : > { %p1291_p3 = scmp.ne.s32.totalorder %s1725_s21, %s1290_s19  ;;  %s1390_s23 = smov [#allocation10]  }
 0x4b8   : > { %s1294_s22 = sshll.u32 %s1390_s23, 4  ;;  %s1295_s22 = int_to_ptr.vmem [resolvable:$false] %s1294_s22 }
 0x4b9   : > { %p1292_p5 = pnand %p1291_p3, %p1811_p12  ;;  %s1296_s12 = scalar_lea.vmem %s1295_s22, 256 }
 0x4ba   : > { %p1297_p11 = scmp.lt.s32.totalorder %s1725_s21, %s1295_s22  ;;  %p1298_p0 = scmp.lt.s32.totalorder %s1296_s12, %s1290_s19 }
 0x4bb   : > { %s1723_s20 = scalar_lea.hbm %s1813_s9, %s1812_s29  ;;  %p1293_p9 = pneg %p1292_p5 }
 0x4bc   : > { %p1299_p4 = por %p1298_p0, %p1297_p11 }
 0x4be   : > { %p1300_p13 = pnand %p1299_p4, %p1293_p9 }
 0x579   : > { %v808_v14 = vpop.f32.mrb[8].mxu0 }
 0x57a   : > { %v809_v15 = vadd.f32 %v808_v14, %v1646_v0  ;;  %v1068_v16 = vpop.f32.mrb[9].mxu0 }
 0x57b   : > { %v811_v17 = vpop.f32.mrb[10].mxu0 }
 0x57c   : > { %v1069_v18 = vpop.f32.mrb[11].mxu0  ;;  %814 = vst.msk [vmem:[%s423_s30] sm:$0xff] %vm437_vm0, %v809_v15 }
 0x57d   : > { %1303 = shalt.err (!%p1300_p13)
}
 0x57e   : > { %s1304_s11 = scalar_lea.hbm %s1723_s20, 128  ;;  %s1308_s29 = scalar_lea.hbm %s1813_s9, 256 }
 0x57f   : > { %p1305_p6 = scmp.ne.s32.totalorder %s1723_s20, %s1304_s11  ;;  %p1309_p8 = scmp.lt.u32.totalorder %s1723_s20, %s1813_s9 }
 0x580   : > { %p1310_p1 = scmp.lt.u32.totalorder %s1308_s29, %s1304_s11  ;;  %p1312_p3 = scmp.lt.u32.totalorder %s1304_s11, %s1723_s20 }
 0x581   : > { %p1306_p7 = pnand %p1305_p6, %p1811_p12 }
 0x582   : > { %p1311_p10 = por %p1310_p1, %p1309_p8 }
 0x583   : > { %p1307_p2 = pneg %p1306_p7 }
 0x584   : > { %p1313_p5 = por %p1312_p3, %p1311_p10 }
 0x586   : > { %p1314_p9 = pnand %p1313_p5, %p1307_p2 }
 0x588   : > { %1317 = shalt.err (!%p1314_p9)
}
 0x589   : > { %1080 = dma.vmem_to_hbm [thread:$0]  (%p1811_p12), %s1725_s21, 128, %s1723_s20, %s817_s13  }
 0x58a PF: > { %s1814_s19 = sld [smem:[#allocation17_spill]]  ;;  %s1815_s23 = sld [smem:[#allocation19_spill]] }
 0x58b   : > { %p1817_p0 = scmp.ge.s32.totalorder %s1380_s18, 2 }
 0x590   : > { %s862_s22 = sand.u32 1, %s1814_s19   ;;  %p1816_p11 = scmp.ne.s32.totalorder %s1815_s23, 0 }
 0x591   : > { %s863_s12 = scalar_lea.sflag [#allocation6], %s862_s22 }
 0x592   : > { %p1096_p4 = pnand %p1817_p0, %p1816_p11 }
 0x594   : > { %1351 = dma.done.wait (!%p1096_p4), %s863_s12, 128  }
 0x595   : > { %1353 = vsyncadd (!%p1096_p4), %s863_s12, 4294967168  ;;  %s872_s11 = scalar_lea.sflag [#allocation12], %s862_s22 }
 0x596   : > { %1355 = dma.done.wait (!%p1096_p4), %s872_s11, 128  }
 0x597   : > { %1357 = vsyncadd (!%p1096_p4), %s872_s11, 4294967168  ;;  %s31_s18 = sadd.s32 1, %s1380_s18   ;;  %s1818_s28 = smov %s1825_s16 }
 0x598   : > { %p28_p13 = scmp.ge.s32.totalorder %s31_s18, 4   ;;  %s1819_s13 = smov %s1364_s14 }
 0x599   : > { %s1820_s14 = smov %s1368_s15  ;;  %s1821_s15 = smov %s1588_s24 }
 0x59a   : > { %s1822_s16 = smov %s1376_s17  ;;  %s1823_s17 = smov %s1818_s28 }
 0x59b   :  { %30 = sbr.rel (!%p28_p13) target bundleno = 12 (0xc), region = 131 }
 0x5a2   :  { %877 = vsyncpa [#allocation5], 1 }
 0x5a3   :  { %879 = vsyncpa [#allocation5 + $0x1], 1 }
 0x5a4   :  { %880 = vsyncpa [#allocation8], 1 }
 0x5a5   :  { %881 = vsyncpa [#allocation6], 1 }
 0x5a6   :  { %883 = vsyncpa [#allocation6 + $0x1], 1 }
 0x5a7   :  { %884 = vsyncpa [#allocation12], 1 }
 0x5a8   :  { %886 = vsyncpa [#allocation12 + $0x1], 1 }

</bundles_post_ra>
